<compile_context>
chip_gen: v6e
topology: v6e:2x2x1
jax: 0.10.0
libtpu: 0.0.40
codegen_flags: <defaults>
</compile_context>

<pallas_src>
import functools

import jax
import jax.numpy as jnp
from jax import lax
from jax.experimental import pallas as pl
from jax.experimental.pallas import tpu as pltpu

_DINO_MEAN = (0.485, 0.456, 0.406)
_DINO_STD = (0.229, 0.224, 0.225)
_DINO_SIZE = (224, 224)
_TOKEN_DIM = 384  # dino_vits8 embedding width


def _bilinear_matrix(in_size, out_size, dtype=jnp.float32):
    """(out, in) interpolation matrix matching F.interpolate bilinear, align_corners=False.

    Every row (including the edge-clamped ones) sums to 1; that invariant is what makes
    the normalize-before-resize fusion inside the kernel exact.
    """
    scale = in_size / out_size
    o = jnp.arange(out_size, dtype=jnp.float32)
    src = jnp.maximum((o + 0.5) * scale - 0.5, 0.0)
    i0 = jnp.floor(src).astype(jnp.int32)
    lam = src - i0.astype(jnp.float32)
    i0 = jnp.clip(i0, 0, in_size - 1)
    i1 = jnp.clip(i0 + 1, 0, in_size - 1)
    m0 = jax.nn.one_hot(i0, in_size, dtype=dtype) * (1.0 - lam)[:, None]
    m1 = jax.nn.one_hot(i1, in_size, dtype=dtype) * lam[:, None]
    return m0 + m1


def _resize_norm_kernel(s_ref, b_ref, x_ref, wwt_ref, wh_ref, o_ref, *, bn):
    # s_ref, b_ref : (C,) f32 in SMEM        per-channel 1/std and -mean/std
    # x_ref        : (bn, H, W)    VMEM      input slices (one channel per grid step)
    # wwt_ref      : (W, OW)       VMEM      column-interp matrix (transposed, lane-dense)
    # wh_ref       : (OH, H)       VMEM      row-interp matrix
    # o_ref        : (bn, OH, OW)  VMEM      resized + normalized output
    c = pl.program_id(1)
    s = s_ref[c]
    b = b_ref[c]

    H, W = x_ref.shape[1], x_ref.shape[2]
    OH = wh_ref.shape[0]
    OW = wwt_ref.shape[1]

    # MeanShift affine on the SMALL input. Exact because each bilinear weight row
    # sums to 1: resize(s*x + b) == s*resize(x) + b.
    xn = x_ref[...].astype(jnp.float32) * s + b                       # (bn, H, W)

    # Column interpolation: one fused matmul over all slices in the block
    # (M = bn*H rows instead of bn separate M=H matmuls).
    t = lax.dot_general(
        xn.reshape(bn * H, W), wwt_ref[...],
        dimension_numbers=(((1,), (0,)), ((), ())),
        preferred_element_type=jnp.float32,
    ).reshape(bn, H, OW)

    # Row interpolation: one batched matmul (bn, OH, H) @ (bn, H, OW) -> (bn, OH, OW).
    # No Python unroll -> bounded vreg live ranges, no spill blow-up.
    wh_b = jnp.broadcast_to(wh_ref[...], (bn, OH, H))
    y = lax.dot_general(
        wh_b, t,
        dimension_numbers=(((2,), (1,)), ((0,), (0,))),
        preferred_element_type=jnp.float32,
    )
    # Plain cast/store: keeps the 224x224 writeback off the VALU (matters on v5e).
    o_ref[...] = y.astype(o_ref.dtype)


def _vmem_capacity_bytes():
    try:
        return int(pltpu.get_tpu_info().vmem_capacity_bytes)
    except Exception:
        return 64 * 1024 * 1024  # conservative default (v7x per-TC physical VMEM)


def resize_and_normalize(x, mean=_DINO_MEAN, std=_DINO_STD, out_size=_DINO_SIZE,
                         out_dtype=jnp.float32):
    """Pallas fusion of MeanShift(normalize)(F.interpolate(x, (224,224), bilinear)) for NCHW."""
    N, C, H, W = x.shape
    assert C == len(mean) == len(std), "MeanShift expects one mean/std per channel"
    OH, OW = out_size

    wwt = _bilinear_matrix(W, OW).T        # (W, OW), lane-dense operand for the fused matmul
    wh = _bilinear_matrix(H, OH)           # (OH, H)
    std_a = jnp.asarray(std, jnp.float32)
    mean_a = jnp.asarray(mean, jnp.float32)
    scale = 1.0 / std_a                    # (C,) -> SMEM
    bias = -mean_a / std_a                 # (C,) -> SMEM

    x_bytes = jnp.dtype(x.dtype).itemsize
    o_bytes = jnp.dtype(out_dtype).itemsize

    # --- block sizing: memory-bound kernel, size from the chip's VMEM ---------------
    vmem_cap = _vmem_capacity_bytes()
    per_slice = (2 * H * W * x_bytes                      # double-buffered input slice
                 + 2 * OH * OW * o_bytes                  # double-buffered output slice
                 + (H * OW + OH * OW + OH * H) * 4)       # t, y, wh_b intermediates
    bn_cap = max(1, (vmem_cap // 4) // per_slice)         # ~25% VMEM budget
    half_n = -(-N // 2) if N > 1 else 1                   # >= 2 blocks along N when possible
    bn = max(1, min(bn_cap, half_n, 128))
    n_blocks = -(-N // bn)                                 # cdiv; partial tail block is safe
    grid = (n_blocks, C)                                   # total steps >= 2 for megacore

    vmem_need = (2 * bn * H * W * x_bytes
                 + 2 * bn * OH * OW * o_bytes
                 + 2 * 4 * (W * OW + OH * max(H, 128))     # interp matrices (lane-padded wh)
                 + bn * 4 * (H * OW + OH * OW + OH * H))   # in-kernel intermediates
    vmem_limit = int(min(max(2 * vmem_need, 16 * 1024 * 1024), (3 * vmem_cap) // 4))

    cost = pl.CostEstimate(
        flops=int(N * C * (2 * H * W * OW + 2 * OH * H * OW + 2 * H * W)),
        transcendentals=0,
        bytes_accessed=int(N * C * (H * W * x_bytes + OH * OW * o_bytes)
                           + 4 * (W * OW + OH * H + 2 * C)),
    )

    out = pl.pallas_call(
        functools.partial(_resize_norm_kernel, bn=bn),
        out_shape=jax.ShapeDtypeStruct((N, C, OH, OW), out_dtype),
        grid=grid,
        in_specs=[
            pl.BlockSpec(memory_space=pltpu.MemorySpace.SMEM),           # scale (C,)
            pl.BlockSpec(memory_space=pltpu.MemorySpace.SMEM),           # bias  (C,)
            pl.BlockSpec((bn, None, H, W), lambda n, c: (n, c, 0, 0)),   # x block
            pl.BlockSpec((W, OW), lambda n, c: (0, 0)),                  # wwt
            pl.BlockSpec((OH, H), lambda n, c: (0, 0)),                  # wh
        ],
        out_specs=pl.BlockSpec((bn, None, OH, OW), lambda n, c: (n, c, 0, 0)),
        compiler_params=pltpu.CompilerParams(
            dimension_semantics=("parallel", "parallel"),
            vmem_limit_bytes=vmem_limit,
        ),
        cost_estimate=cost,
    )(scale, bias, x, wwt, wh)
    return out


def mse_loss(a, b):
    """F.mse_loss(a, b), mean reduction.  Plain jnp on purpose: a 384-element reduction
    is pure pallas_call launch overhead; XLA fuses this into adjacent ops for free."""
    a = a.astype(jnp.float32)
    b = b.astype(jnp.float32)
    return jnp.mean((a - b) ** 2)


def dino_loss(output, target, extract_cls_token):
    """DINOLoss.forward with the fused resize+normalize as a Pallas kernel.

    extract_cls_token: callable mapping a normalized (N, 3, 224, 224) batch to the
    cls-token vector of the DINO ViT-S/8 (the `[-1][0, 0, :]` feature).
    """
    # TODO(synk): the pretrained DINO ViT-S/8 backbone (VitExtractor.get_feature_from_input)
    # has no in-script Pallas equivalent; it must be supplied by the caller.
    out_img = resize_and_normalize(output)
    cls_out = extract_cls_token(out_img)
    tgt_img = lax.stop_gradient(resize_and_normalize(target))      # torch.no_grad() branch
    cls_tgt = lax.stop_gradient(extract_cls_token(tgt_img))
    return mse_loss(cls_out, cls_tgt)


# ----------------------------- pure-JAX references -----------------------------

def _resize_norm_ref(x, mean=_DINO_MEAN, std=_DINO_STD, out_size=_DINO_SIZE):
    N, C, H, W = x.shape
    wh = _bilinear_matrix(H, out_size[0])
    ww = _bilinear_matrix(W, out_size[1])
    y = jnp.einsum("oh,nchw,qw->ncoq", wh, x.astype(jnp.float32), ww)
    m = jnp.asarray(mean, jnp.float32).reshape(1, C, 1, 1)
    s = jnp.asarray(std, jnp.float32).reshape(1, C, 1, 1)
    return y / s - m / s


def _reference_dino_loss(output, target, extract_cls_token):
    a = extract_cls_token(_resize_norm_ref(output))
    b = lax.stop_gradient(extract_cls_token(_resize_norm_ref(target)))
    return jnp.mean((a - b) ** 2)


if __name__ == "__main__":
    key = jax.random.PRNGKey(0)
    k1, k2, k3 = jax.random.split(key, 3)

    N, C, H, W = 2, 3, 16, 16   # RGB images, small spatial size
    output = jax.random.uniform(k1, (N, C, H, W), dtype=jnp.float32)
    target = jax.random.uniform(k2, (N, C, H, W), dtype=jnp.float32)

    # Deterministic stand-in for the DINO cls-token extractor so the full pipeline runs.
    # TODO(synk): replace with a real (JAX) DINO ViT-S/8 forward; not implementable in-script.
    proj = jax.random.normal(k3, (_TOKEN_DIM, C), dtype=jnp.float32)

    def standin_cls_extractor(x):
        pooled = jnp.mean(x[0], axis=(1, 2))   # batch element 0, like [0, 0, :] in the module
        return proj @ pooled                   # (_TOKEN_DIM,)

    # Guard the invariant that makes the normalize-before-resize fusion exact.
    assert jnp.allclose(_bilinear_matrix(H, _DINO_SIZE[0]).sum(axis=1), 1.0, atol=1e-6)
    assert jnp.allclose(_bilinear_matrix(W, _DINO_SIZE[1]).sum(axis=1), 1.0, atol=1e-6)

    # 1) fused bilinear-resize + MeanShift-normalize kernel vs pure JAX
    got_img = jax.block_until_ready(resize_and_normalize(output))
    ref_img = _resize_norm_ref(output)
    assert got_img.shape == (N, C, 224, 224)
    assert jnp.allclose(got_img, ref_img, rtol=5e-2, atol=1e-1), float(
        jnp.max(jnp.abs(got_img - ref_img)))

    # 2) full composed DINOLoss forward (with the stand-in extractor)
    loss = dino_loss(output, target, standin_cls_extractor)
    loss = jax.block_until_ready(loss)
    ref_loss = _reference_dino_loss(output, target, standin_cls_extractor)
    assert jnp.isfinite(loss)
    assert jnp.allclose(loss, ref_loss, rtol=1e-1, atol=1e-3), (float(loss), float(ref_loss))

    print("KERNEL_OK")
</pallas_src>

<mosaic_0001>
module attributes {stable_mosaic.version = 11 : i64} {
  func.func @_resize_norm_kernel(%arg0: i32, %arg1: i32, %arg2: memref<3xf32, #tpu.memory_space<smem>>, %arg3: memref<3xf32, #tpu.memory_space<smem>>, %arg4: memref<1x1x16x16xf32, #tpu.memory_space<vmem>>, %arg5: memref<16x224xf32, #tpu.memory_space<vmem>>, %arg6: memref<224x16xf32, #tpu.memory_space<vmem>>, %arg7: memref<1x1x224x224xf32, #tpu.memory_space<vmem>>) attributes {dimension_semantics = [#tpu.dimension_semantics<parallel>, #tpu.dimension_semantics<parallel>], iteration_bounds = array<i64: 2, 3>, scalar_prefetch = 0 : i64, scratch_operands = 0 : i64, tpu.core_type = #tpu.core_type<tc>, window_params = [{transform_indices = @transform_0, window_bounds = array<i64: 3>}, {transform_indices = @transform_1, window_bounds = array<i64: 3>}, {transform_indices = @transform_2, window_bounds = array<i64: 1, 1, 16, 16>}, {pipeline_mode = #tpu.pipeline_mode<synchronous>, transform_indices = @transform_3, window_bounds = array<i64: 16, 224>}, {pipeline_mode = #tpu.pipeline_mode<synchronous>, transform_indices = @transform_4, window_bounds = array<i64: 224, 16>}, {transform_indices = @transform_5, window_bounds = array<i64: 1, 1, 224, 224>}]} {
    %0 = arith.index_cast %arg1 : i32 to index
    %1 = memref.load %arg2[%0] : memref<3xf32, #tpu.memory_space<smem>>
    %2 = arith.index_cast %arg1 : i32 to index
    %3 = memref.load %arg3[%2] : memref<3xf32, #tpu.memory_space<smem>>
    %c0 = arith.constant 0 : index
    %c0_0 = arith.constant 0 : index
    %c0_1 = arith.constant 0 : index
    %c0_2 = arith.constant 0 : index
    %4 = vector.load %arg4[%c0, %c0_0, %c0_1, %c0_2] : memref<1x1x16x16xf32, #tpu.memory_space<vmem>>, vector<1x1x16x16xf32>
    %5 = vector.shape_cast %4 : vector<1x1x16x16xf32> to vector<1x16x16xf32>
    %6 = vector.broadcast %1 : f32 to vector<1x16x16xf32>
    %7 = arith.mulf %5, %6 : vector<1x16x16xf32>
    %8 = vector.broadcast %3 : f32 to vector<1x16x16xf32>
    %9 = arith.addf %7, %8 : vector<1x16x16xf32>
    %10 = vector.shape_cast %9 : vector<1x16x16xf32> to vector<16x16xf32>
    %c0_3 = arith.constant 0 : index
    %c0_4 = arith.constant 0 : index
    %11 = vector.load %arg5[%c0_3, %c0_4] : memref<16x224xf32, #tpu.memory_space<vmem>>, vector<16x224xf32>
    %cst = arith.constant dense<0.000000e+00> : vector<16x224xf32>
    %12 = tpu.matmul %10, %11, %cst {dimension_numbers = #tpu.dot_dimension_numbers<[1], [0], [0], [1], [0, 0, 1, 1], [], []>} : vector<16x16xf32>, vector<16x224xf32>, vector<16x224xf32> -> vector<16x224xf32>
    %13 = vector.shape_cast %12 : vector<16x224xf32> to vector<1x16x224xf32>
    %c0_5 = arith.constant 0 : index
    %c0_6 = arith.constant 0 : index
    %14 = vector.load %arg6[%c0_5, %c0_6] : memref<224x16xf32, #tpu.memory_space<vmem>>, vector<224x16xf32>
    %15 = vector.shape_cast %14 : vector<224x16xf32> to vector<1x224x16xf32>
    %cst_7 = arith.constant dense<0.000000e+00> : vector<1x224x224xf32>
    %16 = tpu.matmul %15, %13, %cst_7 {dimension_numbers = #tpu.dot_dimension_numbers<[2], [1], [1], [2], [0, 0, 0, 1, 1, 2], [0], [0]>} : vector<1x224x16xf32>, vector<1x16x224xf32>, vector<1x224x224xf32> -> vector<1x224x224xf32>
    %c0_8 = arith.constant 0 : index
    %c0_9 = arith.constant 0 : index
    %c0_10 = arith.constant 0 : index
    %c0_11 = arith.constant 0 : index
    %17 = vector.load %arg7[%c0_8, %c0_9, %c0_10, %c0_11] : memref<1x1x224x224xf32, #tpu.memory_space<vmem>>, vector<1x1x224x224xf32>
    %18 = vector.shape_cast %17 : vector<1x1x224x224xf32> to vector<1x224x224xf32>
    %19 = vector.shape_cast %16 : vector<1x224x224xf32> to vector<1x1x224x224xf32>
    tpu.vector_store %arg7[%c0_8, %c0_9, %c0_10, %c0_11], %19 {strides = array<i32>} : memref<1x1x224x224xf32, #tpu.memory_space<vmem>>, vector<1x1x224x224xf32>,
    return
  }
  func.func @transform_0(%arg0: i32, %arg1: i32) -> i32 {
    %c0_i32 = arith.constant 0 : i32
    %c0_i32_0 = arith.constant 0 : i32
    return %c0_i32 : i32
  }
  func.func @transform_1(%arg0: i32, %arg1: i32) -> i32 {
    %c0_i32 = arith.constant 0 : i32
    %c0_i32_0 = arith.constant 0 : i32
    return %c0_i32 : i32
  }
  func.func @transform_2(%arg0: i32, %arg1: i32) -> (i32, i32, i32, i32) {
    %c0_i32 = arith.constant 0 : i32
    %c0_i32_0 = arith.constant 0 : i32
    %c0_i32_1 = arith.constant 0 : i32
    return %arg0, %arg1, %c0_i32, %c0_i32_0 : i32, i32, i32, i32
  }
  func.func @transform_3(%arg0: i32, %arg1: i32) -> (i32, i32) {
    %c0_i32 = arith.constant 0 : i32
    %c0_i32_0 = arith.constant 0 : i32
    %c0_i32_1 = arith.constant 0 : i32
    return %c0_i32, %c0_i32_0 : i32, i32
  }
  func.func @transform_4(%arg0: i32, %arg1: i32) -> (i32, i32) {
    %c0_i32 = arith.constant 0 : i32
    %c0_i32_0 = arith.constant 0 : i32
    %c0_i32_1 = arith.constant 0 : i32
    return %c0_i32, %c0_i32_0 : i32, i32
  }
  func.func @transform_5(%arg0: i32, %arg1: i32) -> (i32, i32, i32, i32) {
    %c0_i32 = arith.constant 0 : i32
    %c0_i32_0 = arith.constant 0 : i32
    %c0_i32_1 = arith.constant 0 : i32
    return %arg0, %arg1, %c0_i32, %c0_i32_0 : i32, i32, i32, i32
  }
}

</mosaic_0001>

<bundles_post_ra>
// kernel: tpu_custom_call.1
= control target key start
LH: loop header
LB: loop body
LE: loop exit
PB: predicated region body
PF: predicated region fallthrough
CT: control target
= control target key end

     0   :  { %s1794_s0 = inlined_call_operand.hbm [shape: f32[3], index: 0, kind: input, shape index: {}]   ;;  %s1795_s1 = inlined_call_operand.hbm [shape: f32[3], index: 1, kind: input, shape index: {}]   ;;  %s1796_s2 = inlined_call_operand.hbm [shape: f32[2,3,16,16], index: 2, kind: input, shape index: {}]   ;;  %s1797_s3 = inlined_call_operand.hbm [shape: f32[16,224], index: 3, kind: input, shape index: {}]   ;;  %s1798_s4 = inlined_call_operand.vmem [shape: f32[224,16], index: 4, kind: input, shape index: {}]   ;;  %s1799_s5 = inlined_call_operand.hbm [shape: f32[2,3,224,224], index: 5, kind: output, shape index: {}]  }
   0x1   :  { %1804 = sst [smem:[#allocation21_spill]] %s1794_s0 }
   0x2   :  { %1805 = sst [smem:[#allocation22_spill]] %s1795_s1 }
   0x3   :  { %1806 = sst [smem:[#allocation23_spill]] %s1797_s3 }
   0x4   :  { %10 = vsyncpa [#allocation5], 0 }
   0x5   :  { %11 = vsyncpa [#allocation7], 0 }
   0x6   :  { %12 = vsyncpa [#allocation3], 0 }
   0x7   :  { %14 = vsyncpa [#allocation3 + $0x1], 0 }
   0x8   :  { %15 = vsyncpa [#allocation10], 0 }
   0x9   :  { %16 = vsyncpa [#allocation4], 0 }
   0xa   :  { %18 = vsyncpa [#allocation4 + $0x1], 0  ;;  %s1337_s18 = smov 0   ;;  %s1339_s19 = smov 0  }
   0xb   :  { %s1341_s20 = smov 0   ;;  %s1343_s21 = smov 0  }
   0xc   :  { %s1345_s22 = smov 0   ;;  %s1347_s23 = smov 0  }
   0xd   :  { %s1349_s24 = smov 0   ;;  %s1351_s25 = smov 0  }
   0xe LB: > { %1807 = sst [smem:[#allocation17_spill]] %s1265_s18  ;;  %s937_s26 = sadd.s32 4294967295, %s1293_s25   ;;  %s1293_s25 = sphi %s1351_s25, %s24_s25   ;;  %s1289_s24 = sphi %s1349_s24, %s1831_s24   ;;  %s1285_s23 = sphi %s1347_s23, %s1826_s23   ;;  %s1281_s22 = sphi %s1345_s22, %s1830_s22   ;;  %s1277_s21 = sphi %s1343_s21, %s1825_s21   ;;  %s1273_s20 = sphi %s1341_s20, %s1829_s20   ;;  %s1269_s19 = sphi %s1339_s19, %s1828_s19   ;;  %s1265_s18 = sphi %s1337_s18, %s1827_s18  }
   0xf   : > { %1808 = sst [smem:[#allocation18_spill]] %s1285_s23  ;;  %s938_s27 = sadd.s32 4294967294, %s1293_s25  }
  0x10   : > { %p100_p0 = scmp.ne.s32.totalorder %s1269_s19, %s1265_s18  ;;  %p1381_p1 = scmp.eq.s32.totalorder %s937_s26, 0 }
  0x11   : > { %p1385_p2 = scmp.eq.s32.totalorder %s937_s26, 5  ;;  %p174_p3 = scmp.eq.s32.totalorder %s938_s27, 5 }
  0x12   : > { %p1391_p4 = por %p1381_p1, %p100_p0  ;;  %p939_p5 = scmp.ge.s32.totalorder %s1293_s25, 1 }
  0x13   : > { %p1396_p6 = por %p174_p3, %p100_p0  ;;  %p181_p7 = scmp.lt.s32.totalorder %s1293_s25, 7 }
  0x14   : > { %s1295_s8 = smov [#allocation9]   ;;  %s1296_s11 = smov [#allocation2]  }
  0x15   : > { %s1812_s6 = scalar_select %p1396_p6, 1, 0 }
  0x16   : > { %p1401_p8 = pnand %p939_p5, %p181_p7  ;;  %s211_s9 = sshll.u32 %s1295_s8, 4  ;;  %s212_s9 = int_to_ptr.vmem [resolvable:$true] %s211_s9 }
  0x17   : > { %1813 = sst [smem:[#allocation19_spill]] %s1812_s6  ;;  %s1297_s14 = smov [#allocation6]  }
  0x18   : > { %p1009_p9 = pneg %p1401_p8  ;;  %s1816_s0 = sld [smem:[#allocation21_spill]] }
  0x19   : > { %s1817_s1 = sld [smem:[#allocation22_spill]]  ;;  %s1142_s17 = scalar_lea.vmem %s212_s9, 512 }
  0x1a   : > { %p1409_p10 = pnand %p1009_p9, %p1381_p1  ;;  %p1143_p12 = scmp.ne.s32.totalorder %s212_s9, %s1142_s17 }
  0x1b   : > { %p1150_p3 = scmp.lt.s32.totalorder %s212_s9, %s212_s9  ;;  %p1151_p5 = scmp.lt.s32.totalorder %s1142_s17, %s1142_s17 }
  0x1c   : > { %p1133_p11 = pneg %p1409_p10 }
  0x1d   : > { %p1152_p7 = por %p1151_p5, %p1150_p3 }
  0x1e   : > { %1012 = dma.hbm_to_smem (!%p1409_p10), %s1816_s0, 16, %s1296_s11, [#allocation5]  }
  0x1f   : > { %1015 = dma.hbm_to_smem (!%p1409_p10), %s1817_s1, 16, %s1297_s14, [#allocation7]  }
  0x20   : > { %p1145_p13 = pnand %p1143_p12, %p1133_p11 }
  0x22   : > { %p1146_p0 = pneg %p1145_p13 }
  0x24   : > { %p1153_p9 = pnand %p1152_p7, %p1146_p0 }
  0x26   : > { %1156 = shalt.err (!%p1153_p9)
}
  0x27   : > { %s1298_s26 = smov 256   ;;  %s1299_s27 = smov 16  }
  0x28   : > { %s1818_s3 = sld [smem:[#allocation23_spill]]  ;;  %s33_s12 = sadd.s32 1, %s1285_s23 }
  0x29   : > { %p34_p11 = scmp.ge.s32.totalorder %s33_s12, 3  ;;  %s36_s13 = sadd.s32 1, %s1289_s24 }
  0x2a   : > { %s87_s14 = sadd.s32 1, %s1273_s20  ;;  %p94_p12 = scmp.ne.s32.totalorder %s1273_s20, %s1269_s19 }
  0x2b   : > { %s1833_s12 = smov (%p34_p11, %s33_s12), 0  ;;  %s1835_s13 = smov (!%p34_p11, %s36_s13), %s1289_s24 }
  0x2c   : > { %1819 = sst [smem:[#allocation20_spill]] %s1833_s12  ;;  %s83_s15 = ssub.s32 %s1285_s23, %s1833_s12 }
  0x2d   : > { %p95_p13 = scmp.eq.s32.totalorder %s1293_s25, 0  ;;  %p38_p0 = scmp.ge.s32.totalorder %s1835_s13, 2 }
  0x2e   : > { %1018 = dma.hbm_to_vmem [thread:$0]  (!%p1409_p10), %s1818_s3, 512, %s212_s9, [#allocation10], %s1298_s26, %s1298_s26, %s1299_s27  }
  0x2f   : > { %p1443_p3 = por %p1385_p2, %p94_p12  ;;  %p1447_p10 = por %p95_p13, %p94_p12 }
  0x30   : > { %p1030_p5 = scmp.lt.s32.totalorder %s1293_s25, 6  ;;  %s1837_s13 = smov (%p38_p0, %s1835_s13), 0 }
  0x31   : > { %s228_s16 = sand.u32 1, %s1273_s20   ;;  %s945_s17 = sshll.u32 %s1285_s23, 1 }
  0x32   : > { %s82_s26 = ssub.s32 %s1289_s24, %s1837_s13  ;;  %s944_s8 = sshll.u32 %s228_s16, 4 }
  0x33   : > { %s84_s27 = sor.u32 %s83_s15, %s82_s26  ;;  %s989_s29 = smul.u32 6, %s1289_s24 }
  0x34   : > { %p85_p7 = scmp.eq.s32.totalorder %s84_s27, 0  ;;  %s232_s11 = scalar_lea.vmem [#allocation8], %s944_s8 }
  0x35   : > { %s241_s0 = sshll.u32 %s232_s11, 4  ;;  %s238_s3 = sadd.s32 %s989_s29, %s945_s17  ;;  %s242_s0 = int_to_ptr.vmem [resolvable:$true] %s241_s0 }
  0x36   : > { %s1460_s1 = scalar_select %p85_p7, %s1273_s20, %s87_s14  }
  0x37   : > { %s946_s12 = sshll.u32 %s238_s3, 7  ;;  %p1466_p2 = pnand %p1030_p5, %p1447_p10 }
  0x38   : > { %s240_s15 = scalar_lea.hbm %s1796_s2, %s946_s12  ;;  %s229_s26 = scalar_lea.sflag [#allocation3], %s228_s16 }
  0x39   : > { %p1159_p9 = pneg %p1466_p2  ;;  %s1170_s27 = scalar_lea.vmem %s242_s0, 256 }
  0x3a   : > { %p1171_p11 = scmp.ne.s32.totalorder %s242_s0, %s1170_s27  ;;  %s1300_s14 = smov [#allocation8]  }
  0x3b   : > { %s1175_s3 = sshll.u32 %s1300_s14, 4  ;;  %s1176_s3 = int_to_ptr.vmem [resolvable:$false] %s1175_s3 }
  0x3c   : > { %p1173_p12 = pnand %p1171_p11, %p1159_p9  ;;  %s1177_s9 = scalar_lea.vmem %s1176_s3, 512 }
  0x3d   : > { %p1178_p0 = scmp.lt.s32.totalorder %s242_s0, %s1176_s3  ;;  %p1179_p10 = scmp.lt.s32.totalorder %s1177_s9, %s1170_s27 }
  0x3e   : > { %p1174_p13 = pneg %p1173_p12 }
  0x3f   : > { %p1180_p5 = por %p1179_p10, %p1178_p0 }
  0x41   : > { %p1181_p7 = pnand %p1180_p5, %p1174_p13 }
  0x43   : > { %1184 = shalt.err (!%p1181_p7)
}
  0x44   : > { %s1301_s17 = smov 128   ;;  %s1302_s18 = smov 8  }
  0x45   : > { %1022 = dma.hbm_to_vmem [thread:$0]  (!%p1466_p2), %s240_s15, 256, %s242_s0, %s229_s26, %s1301_s17, %s1301_s17, %s1302_s18  }
  0x46   : > { %253 = sbr.rel (%p1401_p8) target bundleno = 565 (0x235), region = 40 }
  0x4b   : > { %1244 = dma.done.wait (%p1381_p1), [#allocation5], 16  }
  0x4c   : > { %1246 = vsyncadd (%p1381_p1), [#allocation5], 4294967280 }
  0x4d   : > { %1248 = dma.done.wait (%p1381_p1), [#allocation7], 16  }
  0x4e   : > { %1250 = vsyncadd (%p1381_p1), [#allocation7], 4294967280  ;;  %s1488_s23 = sand.u32 1, %s1269_s19  }
  0x4f   : > { %s950_s0 = sshll.u32 %s1488_s23, 4  ;;  %s264_s6 = scalar_lea.sflag [#allocation3], %s1488_s23 }
  0x50   : > { %s267_s7 = scalar_lea.vmem [#allocation8], %s950_s0 }
  0x51   : > { %1252 = dma.done.wait (%p1391_p4), %s264_s6, 256  }
  0x52   : > { %1254 = vsyncadd (%p1391_p4), %s264_s6, 4294967040 }
  0x53   : > { %1256 = dma.done.wait (%p1381_p1), [#allocation10], 512  }
  0x54   : > { %1258 = vsyncadd (%p1381_p1), [#allocation10], 4294966784 }
  0x55   : > { %276 = sfence }
  0x56   : > { %v312_v0 = vld [vmem:[#allocation9 + $0x18] sm:$0xff]  ;;  %v311_v1 = vld [vmem:[#allocation9 + $0x10] sm:$0xff]  ;;  %v310_v2 = vld [vmem:[#allocation9 + $0x8] sm:$0xff]  ;;  %s299_s12 = sld [smem:[#allocation2 + %s1277_s21]]  ;;  %v1303_v4 = vmov 0.0   ;;  %vm313_vm0 = vcmask 130048  }
  0x57   : > { %348 = vmatprep.subr.mxu0 %v312_v0  ;;  %v309_v3 = vld [vmem:[#allocation9] sm:$0xff]  ;;  %384 = vmatprep.mubr.f32.mxu0 %v1303_v4  ;;  %s300_s30 = sld [smem:[#allocation6 + %s1277_s21]]  ;;  %v302_v6 = vld [vmem:[%s267_s7 + $0x8] sm:$0xff]  ;;  %v411_v19 = vld [vmem:[%s1798_s4 + $0x70] sm:$0xff]  ;;  %s990_s8 = smul.u32 448, %s1488_s23  ;;  %vm743_vm1 = vcmask 785408  }
  0x58   : > { %349 = vmatpush1.msra.mxu0 %v311_v1  ;;  %651 = vmatprep.mubr.f32.mxu1 %v1303_v4  ;;  %v301_v5 = vld [vmem:[%s267_s7] sm:$0xff]  ;;  %v410_v17 = vld [vmem:[%s1798_s4 + $0x68] sm:$0xff]  ;;  %v412_v21 = vld [vmem:[%s1798_s4 + $0x78] sm:$0xff]  ;;  %s991_s11 = smul.u32 56, %s1277_s21  ;;  %s800_s9 = scalar_lea.sflag [#allocation4], %s1488_s23 }
  0x59   : > { %350 = vmatprep.subr.mxu0 %v310_v2  ;;  %v397_v18 = vld [vmem:[%s1798_s4] sm:$0xff]  ;;  %v398_v20 = vld [vmem:[%s1798_s4 + $0x8] sm:$0xff]  ;;  %v399_v22 = vld [vmem:[%s1798_s4 + $0x10] sm:$0xff]  ;;  %s1647_s29 = scalar_lea.vmem [#allocation11], %s990_s8  ;;  %s992_s15 = smul.u32 168, %s1281_s22 }
  0x5a   : > { %351 = vmatpush1.msra.mxu0 %v309_v3  ;;  %v413_v23 = vld [vmem:[%s1798_s4 + $0x80] sm:$0xff]  ;;  %v400_v24 = vld [vmem:[%s1798_s4 + $0x18] sm:$0xff]  ;;  %v414_v25 = vld [vmem:[%s1798_s4 + $0x88] sm:$0xff]  ;;  %s815_s26 = sshll.u32 %s1647_s29, 4  ;;  %s1304_s18 = smov [#allocation11]   ;;  %s1738_s26 = int_to_ptr.vmem [resolvable:$true] %s815_s26 }
  0x5b   : > { %v401_v26 = vld [vmem:[%s1798_s4 + $0x20] sm:$0xff]  ;;  %v415_v27 = vld [vmem:[%s1798_s4 + $0x90] sm:$0xff]  ;;  %v402_v28 = vld [vmem:[%s1798_s4 + $0x28] sm:$0xff]  ;;  %s812_s21 = sadd.s32 %s992_s15, %s991_s11  ;;  %s1185_s17 = scalar_lea.vmem %s1738_s26, 7168 }
  0x5c   : > { %v303_v7 = vstv %s299_s12  ;;  %v416_v29 = vld [vmem:[%s1798_s4 + $0x98] sm:$0xff]  ;;  %v403_v30 = vld [vmem:[%s1798_s4 + $0x30] sm:$0xff]  ;;  %v417_v31 = vld [vmem:[%s1798_s4 + $0xa0] sm:$0xff]  ;;  %s982_s22 = sshll.u32 %s812_s21, 7  ;;  %p1186_p1 = scmp.ne.s32.totalorder %s1738_s26, %s1185_s17 }
  0x5d   : > { %v304_v8 = vmul.f32 %v303_v7, %v301_v5  ;;  %v306_v9 = vstv %s300_s30  ;;  %v305_v10 = vmul.f32 %v303_v7, %v302_v6  ;;  %v404_v32 = vld [vmem:[%s1798_s4 + $0x38] sm:$0xff]  ;;  %v418_v33 = vld [vmem:[%s1798_s4 + $0xa8] sm:$0xff]  ;;  %v405_v34 = vld [vmem:[%s1798_s4 + $0x40] sm:$0xff]  ;;  %s1736_s3 = scalar_lea.hbm %s1799_s5, %s982_s22  ;;  %s1189_s0 = sshll.u32 %s1304_s18, 4  ;;  %s1190_s0 = int_to_ptr.vmem [resolvable:$false] %s1189_s0 }
  0x5e   : > { %v419_v35 = vld [vmem:[%s1798_s4 + $0xb0] sm:$0xff]  ;;  %v406_v36 = vld [vmem:[%s1798_s4 + $0x48] sm:$0xff]  ;;  %v420_v37 = vld [vmem:[%s1798_s4 + $0xb8] sm:$0xff]  ;;  %p1187_p4 = pnand %p1186_p1, %p1443_p3  ;;  %s1191_s6 = scalar_lea.vmem %s1190_s0, 14336 }
  0x5f   : > { %v307_v11 = vadd.f32 %v306_v9, %v304_v8  ;;  %v308_v12 = vadd.f32 %v306_v9, %v305_v10  ;;  %v407_v38 = vld [vmem:[%s1798_s4 + $0x50] sm:$0xff]  ;;  %v421_v39 = vld [vmem:[%s1798_s4 + $0xc0] sm:$0xff]  ;;  %v408_v40 = vld [vmem:[%s1798_s4 + $0x58] sm:$0xff]  ;;  %p1192_p2 = scmp.lt.s32.totalorder %s1738_s26, %s1190_s0  ;;  %p1193_p9 = scmp.lt.s32.totalorder %s1191_s6, %s1185_s17 }
  0x60   : > { %v422_v41 = vld [vmem:[%s1798_s4 + $0xc8] sm:$0xff]  ;;  %v409_v42 = vld [vmem:[%s1798_s4 + $0x60] sm:$0xff]  ;;  %v423_v43 = vld [vmem:[%s1798_s4 + $0xd0] sm:$0xff]  ;;  %p1188_p8 = pneg %p1187_p4 }
  0x61   : > { %952 = vmatmul.mubr.msk.f32.vlgmr.msra.gmra.mxu0 %vm313_vm0, %v307_v11  ;;  %v424_v44 = vld [vmem:[%s1798_s4 + $0xd8] sm:$0xff]  ;;  %p1194_p11 = por %p1193_p9, %p1192_p2 }
  0x62   : > { %390 = vmatprep.mubr.f32.mxu0 %v1303_v4 }
  0x63   : > { %p1195_p12 = pnand %p1194_p11, %p1188_p8 }
  0x65   : > { %953 = vmatmul.mubr.msk.f32.gmra.mxu0 %vm313_vm0, %v308_v12 }
  0x66   : > { %573 = vmatprep.mubr.f32.mxu0 %v1303_v4 }
 0x121   : > { %v386_v13 = vpop.f32.mrf.mxu0 }
 0x123   : > { %v388_v14 = vpop.f32.mrf.mxu0 }
 0x125   : > { %v392_v15 = vpop.f32.mrf.mxu0 }
 0x127   : > { %v394_v16 = vpop.f32.mrf.mxu0 }
 0x128   : > { %537 = vmatprep.subr.mxu0 %v394_v16  ;;  %985 = vmatprep.subr.mxu1 %v394_v16 }
 0x129   : > { %538 = vmatpush1.msra.mxu0 %v392_v15  ;;  %987 = vmatpush1.msra.mxu1 %v392_v15 }
 0x12a   : > { %539 = vmatprep.subr.mxu0 %v388_v14  ;;  %986 = vmatprep.subr.mxu1 %v388_v14 }
 0x12b   : > { %540 = vmatpush1.msra.mxu0 %v386_v13  ;;  %988 = vmatpush1.msra.mxu1 %v386_v13 }
 0x12c   : > { %967 = vmatmul.mubr.msk.f32.vlgmr.msra.gmra.mxu1 %vm313_vm0, %v410_v17  ;;  %954 = vmatmul.mubr.msk.f32.vlgmr.msra.gmra.mxu0 %vm313_vm0, %v397_v18 }
 0x12d   : > { %657 = vmatprep.mubr.f32.mxu1 %v1303_v4  ;;  %579 = vmatprep.mubr.f32.mxu0 %v1303_v4 }
 0x130   : > { %968 = vmatmul.mubr.msk.f32.gmra.mxu1 %vm313_vm0, %v411_v19  ;;  %955 = vmatmul.mubr.msk.f32.gmra.mxu0 %vm313_vm0, %v398_v20 }
 0x131   : > { %663 = vmatprep.mubr.f32.mxu1 %v1303_v4  ;;  %585 = vmatprep.mubr.f32.mxu0 %v1303_v4 }
 0x134   : > { %969 = vmatmul.mubr.msk.f32.gmra.mxu1 %vm313_vm0, %v412_v21  ;;  %956 = vmatmul.mubr.msk.f32.gmra.mxu0 %vm313_vm0, %v399_v22 }
 0x135   : > { %669 = vmatprep.mubr.f32.mxu1 %v1303_v4  ;;  %591 = vmatprep.mubr.f32.mxu0 %v1303_v4 }
 0x138   : > { %970 = vmatmul.mubr.msk.f32.gmra.mxu1 %vm313_vm0, %v413_v23  ;;  %957 = vmatmul.mubr.msk.f32.gmra.mxu0 %vm313_vm0, %v400_v24 }
 0x139   : > { %675 = vmatprep.mubr.f32.mxu1 %v1303_v4  ;;  %597 = vmatprep.mubr.f32.mxu0 %v1303_v4 }
 0x13c   : > { %971 = vmatmul.mubr.msk.f32.gmra.mxu1 %vm313_vm0, %v414_v25  ;;  %958 = vmatmul.mubr.msk.f32.gmra.mxu0 %vm313_vm0, %v401_v26 }
 0x13d   : > { %681 = vmatprep.mubr.f32.mxu1 %v1303_v4  ;;  %603 = vmatprep.mubr.f32.mxu0 %v1303_v4 }
 0x140   : > { %972 = vmatmul.mubr.msk.f32.gmra.mxu1 %vm313_vm0, %v415_v27  ;;  %959 = vmatmul.mubr.msk.f32.gmra.mxu0 %vm313_vm0, %v402_v28 }
 0x141   : > { %687 = vmatprep.mubr.f32.mxu1 %v1303_v4  ;;  %609 = vmatprep.mubr.f32.mxu0 %v1303_v4 }
 0x144   : > { %973 = vmatmul.mubr.msk.f32.gmra.mxu1 %vm313_vm0, %v416_v29  ;;  %960 = vmatmul.mubr.msk.f32.gmra.mxu0 %vm313_vm0, %v403_v30 }
 0x145   : > { %693 = vmatprep.mubr.f32.mxu1 %v1303_v4  ;;  %615 = vmatprep.mubr.f32.mxu0 %v1303_v4 }
 0x148   : > { %974 = vmatmul.mubr.msk.f32.gmra.mxu1 %vm313_vm0, %v417_v31  ;;  %961 = vmatmul.mubr.msk.f32.gmra.mxu0 %vm313_vm0, %v404_v32 }
 0x149   : > { %699 = vmatprep.mubr.f32.mxu1 %v1303_v4  ;;  %621 = vmatprep.mubr.f32.mxu0 %v1303_v4 }
 0x14c   : > { %975 = vmatmul.mubr.msk.f32.gmra.mxu1 %vm313_vm0, %v418_v33  ;;  %962 = vmatmul.mubr.msk.f32.gmra.mxu0 %vm313_vm0, %v405_v34 }
 0x14d   : > { %705 = vmatprep.mubr.f32.mxu1 %v1303_v4  ;;  %627 = vmatprep.mubr.f32.mxu0 %v1303_v4 }
 0x150   : > { %976 = vmatmul.mubr.msk.f32.gmra.mxu1 %vm313_vm0, %v419_v35  ;;  %963 = vmatmul.mubr.msk.f32.gmra.mxu0 %vm313_vm0, %v406_v36 }
 0x151   : > { %711 = vmatprep.mubr.f32.mxu1 %v1303_v4  ;;  %633 = vmatprep.mubr.f32.mxu0 %v1303_v4 }
 0x154   : > { %977 = vmatmul.mubr.msk.f32.gmra.mxu1 %vm313_vm0, %v420_v37  ;;  %964 = vmatmul.mubr.msk.f32.gmra.mxu0 %vm313_vm0, %v407_v38 }
 0x155   : > { %717 = vmatprep.mubr.f32.mxu1 %v1303_v4  ;;  %639 = vmatprep.mubr.f32.mxu0 %v1303_v4 }
 0x158   : > { %978 = vmatmul.mubr.msk.f32.gmra.mxu1 %vm313_vm0, %v421_v39  ;;  %965 = vmatmul.mubr.msk.f32.gmra.mxu0 %vm313_vm0, %v408_v40 }
 0x159   : > { %723 = vmatprep.mubr.f32.mxu1 %v1303_v4  ;;  %645 = vmatprep.mubr.f32.mxu0 %v1303_v4 }
 0x15c   : > { %979 = vmatmul.mubr.msk.f32.gmra.mxu1 %vm313_vm0, %v422_v41  ;;  %966 = vmatmul.mubr.msk.f32.gmra.mxu0 %vm313_vm0, %v409_v42 }
 0x15d   : > { %729 = vmatprep.mubr.f32.mxu1 %v1303_v4 }
 0x160   : > { %980 = vmatmul.mubr.msk.f32.gmra.mxu1 %vm313_vm0, %v423_v43 }
 0x161   : > { %735 = vmatprep.mubr.f32.mxu1 %v1303_v4 }
 0x164   : > { %981 = vmatmul.mubr.msk.f32.gmra.mxu1 %vm313_vm0, %v424_v44 }
 0x1ec   : > { %v653_v45 = vpop.f32.mrf.mxu1  ;;  %v575_v46 = vpop.f32.mrf.mxu0 }
 0x1ed   : > { %769 = vst [vmem:[%s1647_s29 + $0xd0] sm:$0xff] %v653_v45  ;;  %742 = vst [vmem:[%s1647_s29] sm:$0xff] %v575_v46 }
 0x1ee   : > { %v655_v47 = vpop.f32.mrf.mxu1  ;;  %v577_v48 = vpop.f32.mrf.mxu0 }
 0x1ef   : > { %770 = vst.msk [vmem:[%s1647_s29 + $0xd8] sm:$0xff] %vm743_vm1, %v655_v47  ;;  %744 = vst.msk [vmem:[%s1647_s29 + $0x8] sm:$0xff] %vm743_vm1, %v577_v48 }
 0x1f0   : > { %v659_v49 = vpop.f32.mrf.mxu1  ;;  %v581_v50 = vpop.f32.mrf.mxu0 }
 0x1f1   : > { %771 = vst [vmem:[%s1647_s29 + $0xe0] sm:$0xff] %v659_v49  ;;  %745 = vst [vmem:[%s1647_s29 + $0x10] sm:$0xff] %v581_v50 }
 0x1f2   : > { %v661_v51 = vpop.f32.mrf.mxu1  ;;  %v583_v52 = vpop.f32.mrf.mxu0 }
 0x1f3   : > { %772 = vst.msk [vmem:[%s1647_s29 + $0xe8] sm:$0xff] %vm743_vm1, %v661_v51  ;;  %746 = vst.msk [vmem:[%s1647_s29 + $0x18] sm:$0xff] %vm743_vm1, %v583_v52 }
 0x1f4   : > { %v665_v53 = vpop.f32.mrf.mxu1  ;;  %v587_v54 = vpop.f32.mrf.mxu0 }
 0x1f5   : > { %773 = vst [vmem:[%s1647_s29 + $0xf0] sm:$0xff] %v665_v53  ;;  %747 = vst [vmem:[%s1647_s29 + $0x20] sm:$0xff] %v587_v54 }
 0x1f6   : > { %v667_v55 = vpop.f32.mrf.mxu1  ;;  %v589_v56 = vpop.f32.mrf.mxu0 }
 0x1f7   : > { %774 = vst.msk [vmem:[%s1647_s29 + $0xf8] sm:$0xff] %vm743_vm1, %v667_v55  ;;  %748 = vst.msk [vmem:[%s1647_s29 + $0x28] sm:$0xff] %vm743_vm1, %v589_v56 }
 0x1f8   : > { %v671_v57 = vpop.f32.mrf.mxu1  ;;  %v593_v58 = vpop.f32.mrf.mxu0 }
 0x1f9   : > { %775 = vst [vmem:[%s1647_s29 + $0x100] sm:$0xff] %v671_v57  ;;  %749 = vst [vmem:[%s1647_s29 + $0x30] sm:$0xff] %v593_v58 }
 0x1fa   : > { %v673_v59 = vpop.f32.mrf.mxu1  ;;  %v595_v60 = vpop.f32.mrf.mxu0 }
 0x1fb   : > { %776 = vst.msk [vmem:[%s1647_s29 + $0x108] sm:$0xff] %vm743_vm1, %v673_v59  ;;  %750 = vst.msk [vmem:[%s1647_s29 + $0x38] sm:$0xff] %vm743_vm1, %v595_v60 }
 0x1fc   : > { %v677_v61 = vpop.f32.mrf.mxu1  ;;  %v599_v62 = vpop.f32.mrf.mxu0 }
 0x1fd   : > { %777 = vst [vmem:[%s1647_s29 + $0x110] sm:$0xff] %v677_v61  ;;  %751 = vst [vmem:[%s1647_s29 + $0x40] sm:$0xff] %v599_v62 }
 0x1fe   : > { %v679_v63 = vpop.f32.mrf.mxu1  ;;  %v601_v0 = vpop.f32.mrf.mxu0 }
 0x1ff   : > { %778 = vst.msk [vmem:[%s1647_s29 + $0x118] sm:$0xff] %vm743_vm1, %v679_v63  ;;  %752 = vst.msk [vmem:[%s1647_s29 + $0x48] sm:$0xff] %vm743_vm1, %v601_v0 }
 0x200   : > { %v683_v1 = vpop.f32.mrf.mxu1  ;;  %v605_v2 = vpop.f32.mrf.mxu0 }
 0x201   : > { %779 = vst [vmem:[%s1647_s29 + $0x120] sm:$0xff] %v683_v1  ;;  %753 = vst [vmem:[%s1647_s29 + $0x50] sm:$0xff] %v605_v2 }
 0x202   : > { %v685_v3 = vpop.f32.mrf.mxu1  ;;  %v607_v4 = vpop.f32.mrf.mxu0 }
 0x203   : > { %780 = vst.msk [vmem:[%s1647_s29 + $0x128] sm:$0xff] %vm743_vm1, %v685_v3  ;;  %754 = vst.msk [vmem:[%s1647_s29 + $0x58] sm:$0xff] %vm743_vm1, %v607_v4 }
 0x204   : > { %v689_v5 = vpop.f32.mrf.mxu1  ;;  %v611_v6 = vpop.f32.mrf.mxu0 }
 0x205   : > { %781 = vst [vmem:[%s1647_s29 + $0x130] sm:$0xff] %v689_v5  ;;  %755 = vst [vmem:[%s1647_s29 + $0x60] sm:$0xff] %v611_v6 }
 0x206   : > { %v691_v7 = vpop.f32.mrf.mxu1  ;;  %v613_v8 = vpop.f32.mrf.mxu0 }
 0x207   : > { %782 = vst.msk [vmem:[%s1647_s29 + $0x138] sm:$0xff] %vm743_vm1, %v691_v7  ;;  %756 = vst.msk [vmem:[%s1647_s29 + $0x68] sm:$0xff] %vm743_vm1, %v613_v8 }
 0x208   : > { %v695_v9 = vpop.f32.mrf.mxu1  ;;  %v617_v10 = vpop.f32.mrf.mxu0 }
 0x209   : > { %783 = vst [vmem:[%s1647_s29 + $0x140] sm:$0xff] %v695_v9  ;;  %757 = vst [vmem:[%s1647_s29 + $0x70] sm:$0xff] %v617_v10 }
 0x20a   : > { %v697_v11 = vpop.f32.mrf.mxu1  ;;  %v619_v12 = vpop.f32.mrf.mxu0 }
 0x20b   : > { %784 = vst.msk [vmem:[%s1647_s29 + $0x148] sm:$0xff] %vm743_vm1, %v697_v11  ;;  %758 = vst.msk [vmem:[%s1647_s29 + $0x78] sm:$0xff] %vm743_vm1, %v619_v12 }
 0x20c   : > { %v701_v13 = vpop.f32.mrf.mxu1  ;;  %v623_v14 = vpop.f32.mrf.mxu0 }
 0x20d   : > { %785 = vst [vmem:[%s1647_s29 + $0x150] sm:$0xff] %v701_v13  ;;  %759 = vst [vmem:[%s1647_s29 + $0x80] sm:$0xff] %v623_v14 }
 0x20e   : > { %v703_v15 = vpop.f32.mrf.mxu1  ;;  %v625_v16 = vpop.f32.mrf.mxu0 }
 0x20f   : > { %786 = vst.msk [vmem:[%s1647_s29 + $0x158] sm:$0xff] %vm743_vm1, %v703_v15  ;;  %760 = vst.msk [vmem:[%s1647_s29 + $0x88] sm:$0xff] %vm743_vm1, %v625_v16 }
 0x210   : > { %v707_v17 = vpop.f32.mrf.mxu1  ;;  %v629_v18 = vpop.f32.mrf.mxu0 }
 0x211   : > { %787 = vst [vmem:[%s1647_s29 + $0x160] sm:$0xff] %v707_v17  ;;  %761 = vst [vmem:[%s1647_s29 + $0x90] sm:$0xff] %v629_v18 }
 0x212   : > { %v709_v19 = vpop.f32.mrf.mxu1  ;;  %v631_v20 = vpop.f32.mrf.mxu0 }
 0x213   : > { %788 = vst.msk [vmem:[%s1647_s29 + $0x168] sm:$0xff] %vm743_vm1, %v709_v19  ;;  %762 = vst.msk [vmem:[%s1647_s29 + $0x98] sm:$0xff] %vm743_vm1, %v631_v20 }
 0x214   : > { %v713_v21 = vpop.f32.mrf.mxu1  ;;  %v635_v22 = vpop.f32.mrf.mxu0 }
 0x215   : > { %789 = vst [vmem:[%s1647_s29 + $0x170] sm:$0xff] %v713_v21  ;;  %763 = vst [vmem:[%s1647_s29 + $0xa0] sm:$0xff] %v635_v22 }
 0x216   : > { %v715_v23 = vpop.f32.mrf.mxu1  ;;  %v637_v24 = vpop.f32.mrf.mxu0 }
 0x217   : > { %790 = vst.msk [vmem:[%s1647_s29 + $0x178] sm:$0xff] %vm743_vm1, %v715_v23  ;;  %764 = vst.msk [vmem:[%s1647_s29 + $0xa8] sm:$0xff] %vm743_vm1, %v637_v24 }
 0x218   : > { %v719_v25 = vpop.f32.mrf.mxu1  ;;  %v641_v26 = vpop.f32.mrf.mxu0 }
 0x219   : > { %791 = vst [vmem:[%s1647_s29 + $0x180] sm:$0xff] %v719_v25  ;;  %765 = vst [vmem:[%s1647_s29 + $0xb0] sm:$0xff] %v641_v26 }
 0x21a   : > { %v721_v27 = vpop.f32.mrf.mxu1  ;;  %v643_v28 = vpop.f32.mrf.mxu0 }
 0x21b   : > { %792 = vst.msk [vmem:[%s1647_s29 + $0x188] sm:$0xff] %vm743_vm1, %v721_v27  ;;  %766 = vst.msk [vmem:[%s1647_s29 + $0xb8] sm:$0xff] %vm743_vm1, %v643_v28 }
 0x21c   : > { %v725_v29 = vpop.f32.mrf.mxu1  ;;  %v647_v30 = vpop.f32.mrf.mxu0 }
 0x21d   : > { %793 = vst [vmem:[%s1647_s29 + $0x190] sm:$0xff] %v725_v29  ;;  %767 = vst [vmem:[%s1647_s29 + $0xc0] sm:$0xff] %v647_v30 }
 0x21e   : > { %v727_v31 = vpop.f32.mrf.mxu1  ;;  %v649_v32 = vpop.f32.mrf.mxu0 }
 0x21f   : > { %794 = vst.msk [vmem:[%s1647_s29 + $0x198] sm:$0xff] %vm743_vm1, %v727_v31  ;;  %768 = vst.msk [vmem:[%s1647_s29 + $0xc8] sm:$0xff] %vm743_vm1, %v649_v32 }
 0x220   : > { %v731_v33 = vpop.f32.mrf.mxu1 }
 0x221   : > { %795 = vst [vmem:[%s1647_s29 + $0x1a0] sm:$0xff] %v731_v33 }
 0x222   : > { %v733_v34 = vpop.f32.mrf.mxu1 }
 0x223   : > { %796 = vst.msk [vmem:[%s1647_s29 + $0x1a8] sm:$0xff] %vm743_vm1, %v733_v34 }
 0x224   : > { %v737_v35 = vpop.f32.mrf.mxu1 }
 0x225   : > { %797 = vst [vmem:[%s1647_s29 + $0x1b0] sm:$0xff] %v737_v35 }
 0x226   : > { %v739_v36 = vpop.f32.mrf.mxu1 }
 0x227   : > { %798 = vst.msk [vmem:[%s1647_s29 + $0x1b8] sm:$0xff] %vm743_vm1, %v739_v36 }
 0x228   : > { %1198 = shalt.err (!%p1195_p12)
}
 0x229   : > { %s1199_s7 = scalar_lea.hbm %s1736_s3, 7168  ;;  %s1203_s28 = scalar_lea.hbm %s1799_s5, 43008 }
 0x22a   : > { %p1200_p13 = scmp.ne.s32.totalorder %s1736_s3, %s1199_s7  ;;  %p1204_p5 = scmp.lt.s32.totalorder %s1736_s3, %s1799_s5 }
 0x22b   : > { %p1205_p7 = scmp.lt.s32.totalorder %s1203_s28, %s1199_s7 }
 0x22c   : > { %p1201_p0 = pnand %p1200_p13, %p1443_p3 }
 0x22d   : > { %p1206_p1 = por %p1205_p7, %p1204_p5 }
 0x22e   : > { %p1202_p10 = pneg %p1201_p0 }
 0x230   : > { %p1207_p4 = pnand %p1206_p1, %p1202_p10 }
 0x232   : > { %1210 = shalt.err (!%p1207_p4)
}
 0x233   : > { %s1305_s29 = smov 256   ;;  %s1306_s11 = smov 16  }
 0x234   : > { %1007 = dma.vmem_to_hbm [thread:$0]  (%p1443_p3), %s1738_s26, 7168, %s1736_s3, %s800_s9, %s1305_s29, %s1305_s29, %s1306_s11  }
 0x235 PF: > { %s1823_s15 = sld [smem:[#allocation17_spill]]  ;;  %p1034_p8 = scmp.ge.s32.totalorder %s1293_s25, 2 }
 0x237   : > { %p1024_p2 = pnand %p1034_p8, %p1396_p6 }
 0x239   : > { %p1025_p9 = pneg %p1024_p2 }
 0x23b   : > { %s830_s22 = sand.u32 1, %s1823_s15  }
 0x23c   : > { %s831_s27 = scalar_lea.sflag [#allocation4], %s830_s22 }
 0x23d   : > { %1260 = dma.done.wait (%p1025_p9), %s831_s27, 7168  }
 0x23e   : > { %1262 = vsyncadd (%p1025_p9), %s831_s27, 4294960128  ;;  %s24_s25 = sadd.s32 1, %s1293_s25   ;;  %s1825_s21 = sld [smem:[#allocation18_spill]] }
 0x23f   : > { %p21_p11 = scmp.ge.s32.totalorder %s24_s25, 8   ;;  %s1826_s23 = sld [smem:[#allocation20_spill]] }
 0x240   : > { %s1827_s18 = smov %s1269_s19  ;;  %s1828_s19 = smov %s1273_s20 }
 0x241   : > { %s1829_s20 = smov %s1460_s1  ;;  %s1830_s22 = smov %s1289_s24 }
 0x242   : > { %s1831_s24 = smov %s1837_s13  ;;  %23 = sbr.rel (!%p21_p11) target bundleno = 14 (0xe), region = 98 }
 0x247   :  { %836 = vsyncpa [#allocation3], 1 }
 0x248   :  { %838 = vsyncpa [#allocation3 + $0x1], 1 }
 0x249   :  { %839 = vsyncpa [#allocation10], 1 }
 0x24a   :  { %840 = vsyncpa [#allocation4], 1 }
 0x24b   :  { %842 = vsyncpa [#allocation4 + $0x1], 1 }
 0x24c   :  { %843 = vsyncpa [#allocation5], 1 }
 0x24d   :  { %845 = vsyncpa [#allocation5 + $0x1], 1 }
 0x24e   :  { %846 = vsyncpa [#allocation7], 1 }

</bundles_post_ra>
